<compile_context>
chip_gen: v6e
topology: v6e:2x2x1
jax: 0.10.0
libtpu: 0.0.40
codegen_flags: <defaults>
</compile_context>

<pallas_src>
import math

import jax
import jax.numpy as jnp
from jax.experimental import pallas as pl
from jax.experimental.pallas import tpu as pltpu


def _round_up(x, m):
    return ((x + m - 1) // m) * m


def _choose_fold(action_dim, embedding_dim, *, min_lanes=512, max_fold=64):
    """Smallest F with F*A*E % 128 == 0, bumped until the lane width is wide."""
    base = action_dim * embedding_dim
    fold = 128 // math.gcd(base, 128)
    while fold * base < min_lanes and fold * 2 <= max_fold:
        fold *= 2
    return fold


def make_action_spread_params(w_act, b_act, pos_table, action_dim, fold):
    """Precompute resident kernel operands once (call at module-init time).

    expand  : (fold*A, fold*A*E) f32; expand[fa, fa*E + e] = w_act[e]
    bias_pos: (1, fold*A*E)      f32; b_act[e] + pos_table[a+1, e], tiled `fold`x
    """
    A = action_dim
    E = w_act.shape[0]
    assert A + 1 <= pos_table.shape[0], "action_dim exceeds max_num_actions"
    FA = fold * A
    w32 = w_act.astype(jnp.float32)
    expand = jnp.kron(jnp.eye(FA, dtype=jnp.float32), w32[None, :])      # (FA, FA*E)
    bias_pos = (b_act.astype(jnp.float32)[None, :]
                + pos_table[1:A + 1, :].astype(jnp.float32)).reshape(1, A * E)
    bias_pos = jnp.tile(bias_pos, (1, fold))                             # (1, FA*E)
    return expand, bias_pos


def _action_spread_kernel(x_ref, expand_ref, bias_pos_ref, o_ref):
    # x_ref:        (tm, F*A)     folded rows of the flattened (batch*seq) input
    # expand_ref:   (F*A, F*A*E)  kron(I_{F*A}, w_act), resident across the grid
    # bias_pos_ref: (1, F*A*E)    fused bias + positional rows, resident
    # o_ref:        (tm, F*A*E)   lane-dense output tile (multiple of 128 lanes)
    out = jnp.dot(x_ref[...], expand_ref[...],
                  preferred_element_type=jnp.float32)   # MXU spread
    out = out + bias_pos_ref[...]                        # single fused VPU add
    o_ref[...] = out.astype(o_ref.dtype)


def action_spread_embedding_fwd(x, expand, bias_pos, *, fold, tm=1024,
                                out_dtype=None, min_grid_steps=4):
    """x: [B, T, A]; expand/bias_pos from make_action_spread_params.

    Returns [B, T, A, E].  `out_dtype=jnp.bfloat16` halves HBM writeback (the
    kernel is purely write-bound); default keeps x.dtype for exact semantics.
    """
    B, T, A = x.shape
    FA, FAE = expand.shape
    assert FA == fold * A, "expand/fold inconsistent with action_dim"
    E = FAE // FA
    M = B * T
    if out_dtype is None:
        out_dtype = x.dtype

    # Pad flattened row count to a multiple of `fold`, then fold rows so the
    # output last dim is F*A*E (multiple of 128 -> fully dense, unmasked vst).
    M_pad = _round_up(M, fold)
    x_flat = x.reshape(M, A)
    if M_pad != M:
        x_flat = jnp.pad(x_flat, ((0, M_pad - M), (0, 0)))
    Mf = M_pad // fold
    x_fold = x_flat.reshape(Mf, FA)

    # Row tile: large (amortize ~0.35us/step), sublane-aligned for the output
    # dtype, and with >= min_grid_steps grid steps so megacore (v7x) can shard
    # the write DMAs across both TensorCores.
    align = 16 if jnp.dtype(out_dtype) == jnp.bfloat16 else 8
    if Mf <= align:
        tm_eff = Mf                                   # full-extent block (exempt)
    else:
        tm_eff = min(tm, max(align,
                             _round_up(pl.cdiv(Mf, min_grid_steps), align)))
        tm_eff = min(tm_eff, _round_up(Mf, align))
    grid = (pl.cdiv(Mf, tm_eff),)

    out_fold = pl.pallas_call(
        _action_spread_kernel,
        out_shape=jax.ShapeDtypeStruct((Mf, FAE), out_dtype),
        grid_spec=pltpu.PrefetchScalarGridSpec(
            num_scalar_prefetch=0,
            grid=grid,
            in_specs=[
                pl.BlockSpec((tm_eff, FA), lambda i: (i, 0)),   # folded x tile
                pl.BlockSpec((FA, FAE), lambda i: (0, 0)),      # expand (resident)
                pl.BlockSpec((1, FAE), lambda i: (0, 0)),       # bias+pos (resident)
            ],
            out_specs=pl.BlockSpec((tm_eff, FAE), lambda i: (i, 0)),
        ),
        compiler_params=pltpu.CompilerParams(
            dimension_semantics=("parallel",)),
    )(x_fold, expand, bias_pos)

    out_flat = out_fold.reshape(M_pad, A * E)[:M]
    return out_flat.reshape(B, T, A, E)


if __name__ == "__main__":
    # Module hyperparameters (forward pass only; _action_head / combine_embeds
    # are not part of forward()).
    action_dim = 6
    embedding_dim = 32
    max_num_actions = 100

    key = jax.random.PRNGKey(0)
    k_w, k_b, k_pos, k_x1, k_x2, k_x3 = jax.random.split(key, 6)

    # Deterministic synthetic parameters (shapes from __init__):
    #   action_emb: Linear(1, E)          -> weight [E,1] (flattened to [E]), bias [E]
    #   action_pos_emb: Embedding(101, E) -> table [101, E]
    w_act = jax.random.normal(k_w, (embedding_dim,), dtype=jnp.float32) * 0.5
    b_act = jax.random.normal(k_b, (embedding_dim,), dtype=jnp.float32) * 0.1
    pos_table = jax.random.normal(
        k_pos, (max_num_actions + 1, embedding_dim), dtype=jnp.float32) * 0.02

    # Precompute resident operands once (hoisted out of the per-call path).
    fold = _choose_fold(action_dim, embedding_dim)          # A*E=192 -> fold=4 (768 lanes)
    expand, bias_pos = make_action_spread_params(
        w_act, b_act, pos_table, action_dim, fold)

    def reference(x):
        A = x.shape[-1]
        return x[..., None] * w_act + b_act + pos_table[1:A + 1, :]

    # Case 1: small, fold-aligned row count.
    B, T = 2, 8
    x = jax.random.normal(k_x1, (B, T, action_dim), dtype=jnp.float32)
    out = jax.block_until_ready(
        action_spread_embedding_fwd(x, expand, bias_pos, fold=fold))
    assert out.shape == (B, T, action_dim, embedding_dim)
    assert jnp.allclose(out, reference(x), atol=1e-5, rtol=1e-5), "mismatch (case 1)"

    # Case 2: row count not a multiple of fold -> exercises pad + masked tail block.
    B2, T2 = 2, 7
    x2 = jax.random.normal(k_x2, (B2, T2, action_dim), dtype=jnp.float32)
    out2 = jax.block_until_ready(
        action_spread_embedding_fwd(x2, expand, bias_pos, fold=fold))
    assert out2.shape == (B2, T2, action_dim, embedding_dim)
    assert jnp.allclose(out2, reference(x2), atol=1e-5, rtol=1e-5), "mismatch (case 2)"

    # Case 3: multi-step grid + bf16 writeback (half the HBM write traffic).
    B3, T3 = 4, 64
    x3 = jax.random.normal(k_x3, (B3, T3, action_dim), dtype=jnp.float32)
    out3 = jax.block_until_ready(
        action_spread_embedding_fwd(x3, expand, bias_pos, fold=fold,
                                    out_dtype=jnp.bfloat16))
    assert out3.shape == (B3, T3, action_dim, embedding_dim)
    assert out3.dtype == jnp.bfloat16
    assert jnp.allclose(out3.astype(jnp.float32), reference(x3),
                        atol=2e-2, rtol=2e-2), "mismatch (case 3, bf16)"

    print("KERNEL_OK")
</pallas_src>

<mosaic_0001>
module attributes {stable_mosaic.version = 11 : i64} {
  func.func @_action_spread_kernel(%arg0: i32, %arg1: memref<4x24xf32, #tpu.memory_space<vmem>>, %arg2: memref<24x768xf32, #tpu.memory_space<vmem>>, %arg3: memref<1x768xf32, #tpu.memory_space<vmem>>, %arg4: memref<4x768xf32, #tpu.memory_space<vmem>>) attributes {dimension_semantics = [#tpu.dimension_semantics<parallel>], iteration_bounds = array<i64: 1>, scalar_prefetch = 0 : i64, scratch_operands = 0 : i64, tpu.core_type = #tpu.core_type<tc>, window_params = [{transform_indices = @transform_0, window_bounds = array<i64: 4, 24>}, {pipeline_mode = #tpu.pipeline_mode<synchronous>, transform_indices = @transform_1, window_bounds = array<i64: 24, 768>}, {pipeline_mode = #tpu.pipeline_mode<synchronous>, transform_indices = @transform_2, window_bounds = array<i64: 1, 768>}, {transform_indices = @transform_3, window_bounds = array<i64: 4, 768>}]} {
    %c0 = arith.constant 0 : index
    %c0_0 = arith.constant 0 : index
    %0 = vector.load %arg1[%c0, %c0_0] : memref<4x24xf32, #tpu.memory_space<vmem>>, vector<4x24xf32>
    %c0_1 = arith.constant 0 : index
    %c0_2 = arith.constant 0 : index
    %1 = vector.load %arg2[%c0_1, %c0_2] : memref<24x768xf32, #tpu.memory_space<vmem>>, vector<24x768xf32>
    %cst = arith.constant dense<0.000000e+00> : vector<4x768xf32>
    %2 = tpu.matmul %0, %1, %cst {dimension_numbers = #tpu.dot_dimension_numbers<[1], [0], [0], [1], [0, 0, 1, 1], [], []>} : vector<4x24xf32>, vector<24x768xf32>, vector<4x768xf32> -> vector<4x768xf32>
    %c0_3 = arith.constant 0 : index
    %c0_4 = arith.constant 0 : index
    %3 = vector.load %arg3[%c0_3, %c0_4] : memref<1x768xf32, #tpu.memory_space<vmem>>, vector<1x768xf32>
    %4 = vector.broadcast %3 : vector<1x768xf32> to vector<4x768xf32>
    %5 = arith.addf %2, %4 : vector<4x768xf32>
    %c0_5 = arith.constant 0 : index
    %c0_6 = arith.constant 0 : index
    %6 = vector.load %arg4[%c0_5, %c0_6] : memref<4x768xf32, #tpu.memory_space<vmem>>, vector<4x768xf32>
    tpu.vector_store %arg4[%c0_5, %c0_6], %5 {strides = array<i32>} : memref<4x768xf32, #tpu.memory_space<vmem>>, vector<4x768xf32>,
    return
  }
  func.func @transform_0(%arg0: i32) -> (i32, i32) {
    %c0_i32 = arith.constant 0 : i32
    %c0_i32_0 = arith.constant 0 : i32
    return %arg0, %c0_i32 : i32, i32
  }
  func.func @transform_1(%arg0: i32) -> (i32, i32) {
    %c0_i32 = arith.constant 0 : i32
    %c0_i32_0 = arith.constant 0 : i32
    %c0_i32_1 = arith.constant 0 : i32
    return %c0_i32, %c0_i32_0 : i32, i32
  }
  func.func @transform_2(%arg0: i32) -> (i32, i32) {
    %c0_i32 = arith.constant 0 : i32
    %c0_i32_0 = arith.constant 0 : i32
    %c0_i32_1 = arith.constant 0 : i32
    return %c0_i32, %c0_i32_0 : i32, i32
  }
  func.func @transform_3(%arg0: i32) -> (i32, i32) {
    %c0_i32 = arith.constant 0 : i32
    %c0_i32_0 = arith.constant 0 : i32
    return %arg0, %c0_i32 : i32, i32
  }
}

</mosaic_0001>

<bundles_post_ra>
// kernel: tpu_custom_call.1
= control target key start
LH: loop header
LB: loop body
LE: loop exit
PB: predicated region body
PF: predicated region fallthrough
CT: control target
= control target key end

     0   :  { %8 = vsyncpa [#allocation3], 0  ;;  %s489_s0 = inlined_call_operand.hbm [shape: f32[4,24], index: 0, kind: input, shape index: {}]   ;;  %s490_s1 = inlined_call_operand.hbm [shape: f32[24,768], index: 1, kind: input, shape index: {}]   ;;  %s491_s2 = inlined_call_operand.hbm [shape: f32[1,768], index: 2, kind: input, shape index: {}]   ;;  %s492_s3 = inlined_call_operand.hbm [shape: f32[4,768], index: 3, kind: output, shape index: {}]  }
   0x1   :  { %9 = vsyncpa [#allocation6], 0 }
   0x2   :  { %10 = vsyncpa [#allocation4], 0  ;;  %s447_s12 = smov [#allocation5]  }
   0x3   :  { %s26_s13 = sshll.u32 %s447_s12, 4  ;;  %s27_s13 = int_to_ptr.vmem [resolvable:$true] %s26_s13 }
   0x4   :  { %s369_s14 = scalar_lea.vmem %s27_s13, 2304  ;;  %p374_p1 = scmp.lt.s32.totalorder %s27_s13, %s27_s13 }
   0x5   :  { %p370_p0 = scmp.ne.s32.totalorder %s27_s13, %s369_s14  ;;  %p375_p2 = scmp.lt.s32.totalorder %s369_s14, %s369_s14 }
   0x7   :  { %p376_p3 = por %p375_p2, %p374_p1 }
   0x9   :  { %p377_p4 = pnand %p376_p3, %p370_p0 }
   0xb   :  { %380 = shalt.err (!%p377_p4)
}
   0xc   :  { %s448_s15 = smov 768   ;;  %s449_s16 = smov 48  }
   0xd   :  { %32 = dma.hbm_to_vmem [thread:$0]  %s490_s1, 2304, %s27_s13, [#allocation6], %s448_s15, %s448_s15, %s449_s16  }
   0xe   :  { %s450_s19 = smov [#allocation2]   ;;  %s451_s21 = smov [#allocation7]  }
   0xf   :  { %s17_s20 = sshll.u32 %s450_s19, 4  ;;  %s39_s22 = sshll.u32 %s451_s21, 4  ;;  %s18_s20 = int_to_ptr.vmem [resolvable:$true] %s17_s20  ;;  %s40_s22 = int_to_ptr.vmem [resolvable:$true] %s39_s22 }
  0x10   :  { %s389_s23 = scalar_lea.vmem %s18_s20, 64  ;;  %p394_p6 = scmp.lt.s32.totalorder %s18_s20, %s18_s20 }
  0x11   :  { %p390_p5 = scmp.ne.s32.totalorder %s18_s20, %s389_s23  ;;  %p395_p7 = scmp.lt.s32.totalorder %s389_s23, %s389_s23 }
  0x13   :  { %p396_p8 = por %p395_p7, %p394_p6 }
  0x15   :  { %p397_p9 = pnand %p396_p8, %p390_p5 }
  0x17   :  { %400 = shalt.err (!%p397_p9)
}
  0x18   :  { %20 = dma.hbm_to_vmem [thread:$0]  %s489_s0, 64, %s18_s20, [#allocation3]  }
  0x19   :  { %s409_s26 = scalar_lea.vmem %s40_s22, 96  ;;  %p414_p11 = scmp.lt.s32.totalorder %s40_s22, %s40_s22 }
  0x1a   :  { %p410_p10 = scmp.ne.s32.totalorder %s40_s22, %s409_s26  ;;  %p415_p12 = scmp.lt.s32.totalorder %s409_s26, %s409_s26 }
  0x1c   :  { %p416_p13 = por %p415_p12, %p414_p11 }
  0x1e   :  { %p417_p0 = pnand %p416_p13, %p410_p10 }
  0x20   :  { %420 = shalt.err (!%p417_p0)
}
  0x21   :  { %42 = dma.hbm_to_vmem [thread:$0]  %s491_s2, 96, %s40_s22, [#allocation6]  }
  0x22   :  { %441 = dma.done.wait [#allocation3], 64  }
  0x23   :  { %442 = vsyncadd [#allocation3], 4294967232 }
  0x24   :  { %443 = dma.done.wait [#allocation6], 2400  }
  0x25   :  { %444 = vsyncadd [#allocation6], 4294964896  ;;  %v452_v0 = vmov 0.0   ;;  %v66_v1 = vld [vmem:[#allocation5 + $0x68] sm:$0xff]  ;;  %v65_v2 = vld [vmem:[#allocation5 + $0x60] sm:$0xff]  ;;  %vm103_vm0 = vcmask 195584   ;;  %v73_v20 = vlaneseq }
  0x26   :  { %171 = vmatprep.mubr.f32.mxu0 %v452_v0  ;;  %242 = vmatprep.mubr.f32.mxu1 %v452_v0  ;;  %v60_v3 = vld [vmem:[#allocation5 + $0x38] sm:$0xff]  ;;  %v59_v4 = vld [vmem:[#allocation5 + $0x30] sm:$0xff]  ;;  %v54_v6 = vld [vmem:[#allocation5 + $0x8] sm:$0xff]  ;;  %s453_s0 = smov [#allocation8]  }
  0x27   :  { %133 = vmatprep.subr.mxu0 %v66_v1  ;;  %v68_v5 = vld [vmem:[#allocation5 + $0x78] sm:$0xff]  ;;  %v67_v7 = vld [vmem:[#allocation5 + $0x70] sm:$0xff]  ;;  %v53_v8 = vld [vmem:[#allocation5] sm:$0xff]  ;;  %v74_v21 = vshrl.u32 %v73_v20, 7  ;;  %s341_s2 = sshll.u32 %s453_s0, 4  ;;  %s342_s2 = int_to_ptr.vmem [resolvable:$true] %s341_s2 }
  0x28   :  { %134 = vmatpush1.msra.mxu0 %v65_v2  ;;  %204 = vmatprep.subr.mxu1 %v68_v5  ;;  %v62_v9 = vld [vmem:[#allocation5 + $0x48] sm:$0xff]  ;;  %v61_v10 = vld [vmem:[#allocation5 + $0x40] sm:$0xff]  ;;  %v52_v11 = vld [vmem:[#allocation2] sm:$0xf]  ;;  %s421_s28 = scalar_lea.vmem %s342_s2, 384  ;;  %p426_p2 = scmp.lt.s32.totalorder %s342_s2, %s342_s2 }
  0x29   :  { %135 = vmatprep.subr.mxu0 %v60_v3  ;;  %205 = vmatpush1.msra.mxu1 %v67_v7  ;;  %v70_v12 = vld [vmem:[#allocation5 + $0x88] sm:$0xff]  ;;  %v56_v13 = vld [vmem:[#allocation5 + $0x18] sm:$0xff]  ;;  %v69_v14 = vld [vmem:[#allocation5 + $0x80] sm:$0xff]  ;;  %v75_v22 = vsub.s32 0, %v74_v21  ;;  %v79_v24 = vsub.s32 1, %v74_v21  ;;  %v83_v25 = vsub.s32 2, %v74_v21  ;;  %p422_p1 = scmp.ne.s32.totalorder %s342_s2, %s421_s28  ;;  %p427_p3 = scmp.lt.s32.totalorder %s421_s28, %s421_s28 }
  0x2a   :  { %136 = vmatpush1.msra.mxu0 %v59_v4  ;;  %206 = vmatprep.subr.mxu1 %v62_v9  ;;  %v55_v15 = vld [vmem:[#allocation5 + $0x10] sm:$0xff]  ;;  %v64_v16 = vld [vmem:[#allocation5 + $0x58] sm:$0xff]  ;;  %v58_v18 = vld [vmem:[#allocation5 + $0x28] sm:$0xff]  ;;  %v87_v27 = vsub.s32 3, %v74_v21  ;;  %v91_v33 = vsub.s32 4, %v74_v21  ;;  %v95_v34 = vsub.s32 5, %v74_v21 }
  0x2b   :  { %137 = vmatprep.subr.mxu0 %v54_v6  ;;  %207 = vmatpush1.msra.mxu1 %v61_v10  ;;  %v63_v17 = vld [vmem:[#allocation5 + $0x50] sm:$0xff]  ;;  %v57_v19 = vld [vmem:[#allocation5 + $0x20] sm:$0xff]  ;;  %p428_p4 = por %p427_p3, %p426_p2 }
  0x2c   :  { %138 = vmatpush1.msra.mxu0 %v53_v8  ;;  %208 = vmatprep.subr.mxu1 %v56_v13  ;;  %v71_v23 = vld [vmem:[#allocation7] sm:$0x3f] }
  0x2d   :  { %351 = vmatmul.mubr.msk.f32.vlgmr.msra.gmra.mxu0 %vm103_vm0, %v52_v11  ;;  %275 = vmatprep.subr.mxu0 %v70_v12  ;;  %v76_v26 = vrot.slane %v71_v23, %v75_v22  ;;  %v80_v28 = vrot.slane %v71_v23, %v79_v24  ;;  %v84_v29 = vrot.slane %v71_v23, %v83_v25  ;;  %p429_p5 = pnand %p428_p4, %p422_p1 }
  0x2e   :  { %276 = vmatpush1.msra.mxu0 %v69_v14  ;;  %209 = vmatpush1.msra.mxu1 %v55_v15  ;;  %v88_v32 = vrot.slane %v71_v23, %v87_v27  ;;  %v92_v42 = vrot.slane %v71_v23, %v91_v33  ;;  %v96_v43 = vrot.slane %v71_v23, %v95_v34 }
  0x2f   :  { %277 = vmatprep.subr.mxu0 %v64_v16  ;;  %352 = vmatmul.mubr.msk.f32.vlgmr.msra.gmra.mxu1 %vm103_vm0, %v52_v11 }
  0x30   :  { %278 = vmatpush1.msra.mxu0 %v63_v17  ;;  %313 = vmatprep.mubr.f32.mxu0 %v452_v0 }
  0x31   :  { %279 = vmatprep.subr.mxu0 %v58_v18 }
  0x32   :  { %280 = vmatpush1.msra.mxu0 %v57_v19 }
  0x33   :  { %353 = vmatmul.mubr.msk.f32.vlgmr.msra.gmra.mxu0 %vm103_vm0, %v52_v11 }
  0xed   :  { %v173_v30 = vpop.f32.mrf.mxu0 }
  0xee   :  { %v174_v31 = vadd.f32 %v173_v30, %v76_v26 }
  0xef   :  { %v175_v35 = vpop.f32.mrf.mxu0  ;;  %v244_v36 = vpop.f32.mrf.mxu1 }
  0xf0   :  { %v176_v37 = vadd.f32 %v175_v35, %v80_v28  ;;  %v245_v38 = vadd.f32 %v244_v36, %v84_v29 }
  0xf1   :  { %v246_v39 = vpop.f32.mrf.mxu1 }
  0xf2   :  { %v326_v40 = vcombine.low %v174_v31, %v176_v37  ;;  %v247_v41 = vadd.f32 %v246_v39, %v88_v32 }
  0xf3   :  { %v315_v44 = vpop.f32.mrf.mxu0 }
  0xf4   :  { %332 = vst [vmem:[#allocation8] sm:$0xff] %v326_v40  ;;  %v327_v45 = vcombine.low %v245_v38, %v247_v41  ;;  %v316_v47 = vadd.f32 %v315_v44, %v92_v42 }
  0xf5   :  { %v317_v46 = vpop.f32.mrf.mxu0 }
  0xf6   :  { %333 = vst [vmem:[#allocation8 + $0x8] sm:$0xff] %v327_v45  ;;  %v318_v48 = vadd.f32 %v317_v46, %v96_v43 }
  0xf8   :  { %v328_v49 = vcombine.low %v316_v47, %v318_v48 }
  0xfa   :  { %334 = vst [vmem:[#allocation8 + $0x10] sm:$0xff] %v328_v49 }
  0xfb   :  { %432 = shalt.err (!%p429_p5)
}
  0xfc   :  { %344 = dma.vmem_to_hbm [thread:$0]  %s342_s2, 384, %s492_s3, [#allocation4]  }
  0xfd   :  { %445 = dma.done.wait [#allocation4], 384  }
  0xfe   :  { %446 = vsyncadd [#allocation4], 4294966912 }
  0xff   :  { %348 = vsyncpa [#allocation3], 1 }
 0x100   :  { %349 = vsyncpa [#allocation6], 1 }
 0x101   :  { %350 = vsyncpa [#allocation4], 1 }

</bundles_post_ra>
